<compile_context>
chip_gen: v7x
topology: tpu7x:2x2x1
jax: 0.10.0
libtpu: 0.0.40
codegen_flags: <defaults>
</compile_context>

<pallas_src>
import jax
import jax.numpy as jnp
from jax.experimental import pallas as pl
from jax.experimental.pallas import tpu as pltpu

HIDDEN = 32  # fixed by the module: nn.Linear(embedding_size, 32)


def _attend_body(seqs_ref, mask, w1_ref, b1_ref, w2_ref, out_ref):
    TB, S, E = seqs_ref.shape
    x = seqs_ref[...]                                   # [TB, S, E] native dtype

    # h1: Linear(E, 32) + Tanh -- one fused (TB*S, E) @ (E, 32) MXU GEMM with
    # f32 accumulation (bf16 inputs stay bf16 on the MXU).
    # NOTE: (TB,S,E)->(TB*S,E) is a free relayout only when S % 8 == 0 (f32
    # sublane); for other production S, pad S once in HBM instead of paying a
    # per-step VMEM relayout copy.
    h = jnp.tanh(
        jnp.dot(x.reshape(TB * S, E), w1_ref[...],
                preferred_element_type=jnp.float32)
        + b1_ref[...])                                  # [TB*S, 32] f32

    # gate_layer: Linear(32, 1) as a VPU multiply + lane reduce.  The scalar
    # gate bias b2 is dropped: softmax is shift-invariant, so it is a no-op
    # on the output.
    g = jnp.sum(h.reshape(TB, S, HIDDEN) * w2_ref[...], axis=-1)   # [TB, S]
    if mask is not None:
        g = g + mask.astype(jnp.float32)

    # Numerically stable softmax over the sequence axis (per batch row).
    # Exact division (not approx reciprocal): compute has large slack in this
    # HBM-bound kernel, and it keeps strict parity with the PyTorch module.
    m = jnp.max(g, axis=-1, keepdims=True)               # [TB, 1]
    e = jnp.exp(g - m)                                    # [TB, S]
    p = e / jnp.sum(e, axis=-1, keepdims=True)            # [TB, S]

    # Weighted sum over S: VPU multiply + sublane reduce -> dense (TB, E).
    acc = jnp.sum(x.astype(jnp.float32) * p[:, :, None], axis=1)
    out_ref[...] = acc.astype(out_ref.dtype)


def _kernel_with_mask(seqs_ref, mask_ref, w1_ref, b1_ref, w2_ref, out_ref):
    _attend_body(seqs_ref, mask_ref[...], w1_ref, b1_ref, w2_ref, out_ref)


def _kernel_no_mask(seqs_ref, w1_ref, b1_ref, w2_ref, out_ref):
    _attend_body(seqs_ref, None, w1_ref, b1_ref, w2_ref, out_ref)


def _pick_batch_block(B, S, E, itemsize, gran):
    """Pick a batch block size for the memory-bound regime.

    Targets ~2 MiB of seqs per grid step (large enough to amortize the
    ~0.35 us per-step overhead and reach ~85%+ of HBM roofline; small enough
    that double-buffered seqs + the h intermediate + out stay well below
    every generation's scoped-VMEM default: v5e 16 MiB, v6e 32 MiB, v7x
    32 MiB scoped / 64 MiB physical).  Also keeps >= 8 grid steps where
    possible so dimension_semantics=("parallel",) can shard the batch axis
    across v7x's two TensorCores.
    """
    target_bytes = 2 * 1024 * 1024
    tb = max(gran, target_bytes // max(1, S * E * itemsize))
    tb = min(tb, max(gran, pl.cdiv(B, 8)))
    tb = min(tb, B)
    if tb < B:
        tb = max(gran, (tb // gran) * gran)   # sublane-dense out/mask blocks
    return int(tb)


def self_attend(seqs, w1, b1, w2, b2=None, seq_masks=None, *, batch_block=None):
    """Gated additive self-attention pooling.

    seqs: [B, S, E] (f32 or bf16); seq_masks: optional [B, S].
    Returns [B, E] in seqs.dtype.

    b2 (the gate_layer bias) is accepted for API parity with the PyTorch
    module but is mathematically a no-op (softmax shift-invariance), so it is
    never sent to the kernel.
    """
    del b2
    B, S, E = seqs.shape
    itemsize = jnp.dtype(seqs.dtype).itemsize
    gran = max(8, 32 // itemsize)   # 8 for f32, 16 for bf16, 32 for int8

    if batch_block is None:
        tb = _pick_batch_block(B, S, E, itemsize, gran)
    else:
        tb = min(int(batch_block), B)
        if tb < B and tb % gran:
            tb = min(B, ((tb + gran - 1) // gran) * gran)

    # No wrapper-side padding / slicing: Pallas clips the partial last batch
    # block.  OOB rows compute on undefined data (possibly NaN), but all
    # reductions are per-row and OOB writes are dropped, so this is safe and
    # avoids full-array HBM pad/slice copies around a memory-bound kernel.
    grid = (pl.cdiv(B, tb),)

    # Keep seqs in its native dtype (bf16 halves the dominant HBM stream and
    # is MXU-native); cast W1 to match for a native GEMM, keep the tiny
    # post-GEMM operands in f32 (v5e VPU/EUP have no bf16).
    w1_c = w1.astype(seqs.dtype)
    b1_row = b1.astype(jnp.float32).reshape(1, HIDDEN)
    w2_row = w2.astype(jnp.float32).reshape(1, HIDDEN)

    seqs_spec = pl.BlockSpec((tb, S, E), lambda i: (i, 0, 0))
    # Constant weights: single-buffered (constant index_map -> never
    # re-fetched), freeing their second VMEM buffer for a larger tb.
    weight_specs = [
        pl.BlockSpec((E, HIDDEN), lambda i: (0, 0),
                     pipeline_mode=pl.Buffered(buffer_count=1)),     # W1
        pl.BlockSpec((1, HIDDEN), lambda i: (0, 0),
                     pipeline_mode=pl.Buffered(buffer_count=1)),     # b1
        pl.BlockSpec((1, HIDDEN), lambda i: (0, 0),
                     pipeline_mode=pl.Buffered(buffer_count=1)),     # w2 row
    ]
    out_spec = pl.BlockSpec((tb, E), lambda i: (i, 0))
    out_shape = jax.ShapeDtypeStruct((B, E), seqs.dtype)

    # Per-step VMEM estimate; only raise the scoped limit when the smallest
    # default (v5e 16 MiB) would be tight for large production shapes.
    # TODO(synk): for very large S*E slabs, add an S-tiled online-softmax grid
    # axis (m/l/acc resident across an "arbitrary" S axis) instead of
    # shrinking tb below the HBM-roofline block size.
    blk_bytes = tb * S * E * itemsize
    vmem_est = (2 * blk_bytes                 # seqs pipeline buffers
                + tb * S * HIDDEN * 4         # h intermediate
                + 2 * tb * E * itemsize       # out buffers
                + 2 * tb * S * 4              # mask buffers
                + E * HIDDEN * itemsize + 2 * HIDDEN * 4)
    cp_kwargs = dict(dimension_semantics=("parallel",))
    if vmem_est > 12 * 1024 * 1024:
        cp_kwargs["vmem_limit_bytes"] = min(2 * vmem_est, 100 * 1024 * 1024)
    cparams = pltpu.CompilerParams(**cp_kwargs)

    if seq_masks is None:
        return pl.pallas_call(
            _kernel_no_mask,
            out_shape=out_shape,
            grid_spec=pltpu.PrefetchScalarGridSpec(
                num_scalar_prefetch=0,
                grid=grid,
                in_specs=[seqs_spec] + weight_specs,
                out_specs=out_spec,
            ),
            compiler_params=cparams,
        )(seqs, w1_c, b1_row, w2_row)

    mask_spec = pl.BlockSpec((tb, S), lambda i: (i, 0))
    return pl.pallas_call(
        _kernel_with_mask,
        out_shape=out_shape,
        grid_spec=pltpu.PrefetchScalarGridSpec(
            num_scalar_prefetch=0,
            grid=grid,
            in_specs=[seqs_spec, mask_spec] + weight_specs,
            out_specs=out_spec,
        ),
        compiler_params=cparams,
    )(seqs, seq_masks, w1_c, b1_row, w2_row)


def self_attend_ref(seqs, w1, b1, w2, b2, seq_masks=None):
    """Pure-JAX reference mirroring the PyTorch forward (keeps b2)."""
    h = jnp.tanh(jnp.einsum("bse,eh->bsh", seqs, w1) + b1)
    gates = (jnp.einsum("bsh,ho->bso", h, w2) + b2).squeeze(-1)
    if seq_masks is not None:
        gates = gates + seq_masks
    p = jax.nn.softmax(gates, axis=-1)[..., None]
    return jnp.sum(seqs * p, axis=1)


if __name__ == "__main__":
    B, S, E = 2, 8, 32

    key = jax.random.PRNGKey(0)
    k_seq, k_mask, k_w1, k_b1, k_w2, k_b2 = jax.random.split(key, 6)

    seqs = jax.random.normal(k_seq, (B, S, E), dtype=jnp.float32)
    seq_masks = jnp.where(
        jax.random.uniform(k_mask, (B, S)) > 0.25, 0.0, -1e9
    ).astype(jnp.float32)

    # Deterministic parameter init (PyTorch-Linear-style uniform bounds).
    lim1 = 1.0 / (E ** 0.5)
    w1 = jax.random.uniform(k_w1, (E, HIDDEN), jnp.float32, -lim1, lim1)
    b1 = jax.random.uniform(k_b1, (HIDDEN,), jnp.float32, -lim1, lim1)
    lim2 = 1.0 / (HIDDEN ** 0.5)
    w2 = jax.random.uniform(k_w2, (HIDDEN, 1), jnp.float32, -lim2, lim2)
    b2 = jax.random.uniform(k_b2, (1,), jnp.float32, -lim2, lim2)

    # 1) Masked path, auto batch block.
    out = jax.block_until_ready(self_attend(seqs, w1, b1, w2, b2, seq_masks))
    ref = self_attend_ref(seqs, w1, b1, w2, b2, seq_masks)
    assert out.shape == (B, E)
    assert jnp.allclose(out, ref, atol=1e-4, rtol=1e-4), (
        f"max abs err {jnp.max(jnp.abs(out - ref))}")

    # 2) seq_masks=None path (skips the mask DMA entirely).
    out_nm = jax.block_until_ready(self_attend(seqs, w1, b1, w2, b2, None))
    ref_nm = self_attend_ref(seqs, w1, b1, w2, b2, None)
    assert jnp.allclose(out_nm, ref_nm, atol=1e-4, rtol=1e-4)

    # 3) Partial last batch block (B % tb != 0) with no wrapper-side padding.
    B2 = 40
    k_seq2, k_mask2 = jax.random.split(jax.random.PRNGKey(1), 2)
    seqs2 = jax.random.normal(k_seq2, (B2, S, E), dtype=jnp.float32)
    masks2 = jnp.where(
        jax.random.uniform(k_mask2, (B2, S)) > 0.25, 0.0, -1e9
    ).astype(jnp.float32)
    out2 = jax.block_until_ready(
        self_attend(seqs2, w1, b1, w2, b2, masks2, batch_block=16))
    ref2 = self_attend_ref(seqs2, w1, b1, w2, b2, masks2)
    assert out2.shape == (B2, E)
    assert jnp.allclose(out2, ref2, atol=1e-4, rtol=1e-4), (
        f"max abs err {jnp.max(jnp.abs(out2 - ref2))}")

    # 4) bf16 seqs path: halved HBM stream, MXU-native GEMM, f32 softmax.
    seqs_bf = seqs.astype(jnp.bfloat16)
    out_bf = jax.block_until_ready(
        self_attend(seqs_bf, w1, b1, w2, b2, seq_masks))
    assert out_bf.dtype == jnp.bfloat16 and out_bf.shape == (B, E)
    ref_bf = self_attend_ref(seqs_bf.astype(jnp.float32), w1, b1, w2, b2,
                             seq_masks)
    assert jnp.allclose(out_bf.astype(jnp.float32), ref_bf,
                        atol=5e-2, rtol=5e-2), (
        f"max abs err {jnp.max(jnp.abs(out_bf.astype(jnp.float32) - ref_bf))}")

    print("KERNEL_OK")
</pallas_src>

<mosaic_0001>
module attributes {stable_mosaic.version = 11 : i64} {
  func.func @_kernel_with_mask(%arg0: i32, %arg1: memref<2x8x32xf32, #tpu.memory_space<vmem>>, %arg2: memref<2x8xf32, #tpu.memory_space<vmem>>, %arg3: memref<32x32xf32, #tpu.memory_space<vmem>>, %arg4: memref<1x32xf32, #tpu.memory_space<vmem>>, %arg5: memref<1x32xf32, #tpu.memory_space<vmem>>, %arg6: memref<2x32xf32, #tpu.memory_space<vmem>>) attributes {dimension_semantics = [#tpu.dimension_semantics<parallel>], iteration_bounds = array<i64: 1>, scalar_prefetch = 0 : i64, scratch_operands = 0 : i64, tpu.core_type = #tpu.core_type<tc>, window_params = [{transform_indices = @transform_0, window_bounds = array<i64: 2, 8, 32>}, {transform_indices = @transform_1, window_bounds = array<i64: 2, 8>}, {pipeline_mode = #tpu.pipeline_mode<synchronous>, transform_indices = @transform_2, window_bounds = array<i64: 32, 32>}, {pipeline_mode = #tpu.pipeline_mode<synchronous>, transform_indices = @transform_3, window_bounds = array<i64: 1, 32>}, {pipeline_mode = #tpu.pipeline_mode<synchronous>, transform_indices = @transform_4, window_bounds = array<i64: 1, 32>}, {transform_indices = @transform_5, window_bounds = array<i64: 2, 32>}]} {
    %c0 = arith.constant 0 : index
    %c0_0 = arith.constant 0 : index
    %0 = vector.load %arg2[%c0, %c0_0] : memref<2x8xf32, #tpu.memory_space<vmem>>, vector<2x8xf32>
    %c0_1 = arith.constant 0 : index
    %c0_2 = arith.constant 0 : index
    %c0_3 = arith.constant 0 : index
    %1 = vector.load %arg1[%c0_1, %c0_2, %c0_3] : memref<2x8x32xf32, #tpu.memory_space<vmem>>, vector<2x8x32xf32>
    %2 = vector.shape_cast %1 : vector<2x8x32xf32> to vector<16x32xf32>
    %c0_4 = arith.constant 0 : index
    %c0_5 = arith.constant 0 : index
    %3 = vector.load %arg3[%c0_4, %c0_5] : memref<32x32xf32, #tpu.memory_space<vmem>>, vector<32x32xf32>
    %cst = arith.constant dense<0.000000e+00> : vector<16x32xf32>
    %4 = tpu.matmul %2, %3, %cst {dimension_numbers = #tpu.dot_dimension_numbers<[1], [0], [0], [1], [0, 0, 1, 1], [], []>} : vector<16x32xf32>, vector<32x32xf32>, vector<16x32xf32> -> vector<16x32xf32>
    %c0_6 = arith.constant 0 : index
    %c0_7 = arith.constant 0 : index
    %5 = vector.load %arg4[%c0_6, %c0_7] : memref<1x32xf32, #tpu.memory_space<vmem>>, vector<1x32xf32>
    %6 = vector.broadcast %5 : vector<1x32xf32> to vector<16x32xf32>
    %7 = arith.addf %4, %6 : vector<16x32xf32>
    %8 = math.tanh %7 : vector<16x32xf32>
    %9 = vector.shape_cast %8 : vector<16x32xf32> to vector<2x8x32xf32>
    %c0_8 = arith.constant 0 : index
    %c0_9 = arith.constant 0 : index
    %10 = vector.load %arg5[%c0_8, %c0_9] : memref<1x32xf32, #tpu.memory_space<vmem>>, vector<1x32xf32>
    %11 = vector.shape_cast %10 : vector<1x32xf32> to vector<1x1x32xf32>
    %12 = vector.broadcast %11 : vector<1x1x32xf32> to vector<2x8x32xf32>
    %13 = arith.mulf %9, %12 : vector<2x8x32xf32>
    %cst_10 = arith.constant dense<0.000000e+00> : vector<2x8xf32>
    %14 = vector.multi_reduction <add>, %13, %cst_10 [2] : vector<2x8x32xf32> to vector<2x8xf32>
    %15 = arith.addf %14, %0 : vector<2x8xf32>
    %cst_11 = arith.constant dense<0xFF800000> : vector<2xf32>
    %16 = vector.multi_reduction <maximumf>, %15, %cst_11 [1] : vector<2x8xf32> to vector<2xf32>
    %17 = vector.shape_cast %16 : vector<2xf32> to vector<2x1xf32>
    %18 = vector.broadcast %17 : vector<2x1xf32> to vector<2x8xf32>
    %19 = arith.subf %15, %18 : vector<2x8xf32>
    %20 = math.exp %19 : vector<2x8xf32>
    %cst_12 = arith.constant dense<0.000000e+00> : vector<2xf32>
    %21 = vector.multi_reduction <add>, %20, %cst_12 [1] : vector<2x8xf32> to vector<2xf32>
    %22 = vector.shape_cast %21 : vector<2xf32> to vector<2x1xf32>
    %23 = vector.broadcast %22 : vector<2x1xf32> to vector<2x8xf32>
    %24 = arith.divf %20, %23 : vector<2x8xf32>
    %25 = vector.shape_cast %24 : vector<2x8xf32> to vector<2x8x1xf32>
    %26 = vector.broadcast %25 : vector<2x8x1xf32> to vector<2x8x32xf32>
    %27 = arith.mulf %1, %26 : vector<2x8x32xf32>
    %cst_13 = arith.constant dense<0.000000e+00> : vector<2x32xf32>
    %28 = vector.multi_reduction <add>, %27, %cst_13 [1] : vector<2x8x32xf32> to vector<2x32xf32>
    %c0_14 = arith.constant 0 : index
    %c0_15 = arith.constant 0 : index
    %29 = vector.load %arg6[%c0_14, %c0_15] : memref<2x32xf32, #tpu.memory_space<vmem>>, vector<2x32xf32>
    tpu.vector_store %arg6[%c0_14, %c0_15], %28 {strides = array<i32>} : memref<2x32xf32, #tpu.memory_space<vmem>>, vector<2x32xf32>,
    return
  }
  func.func @transform_0(%arg0: i32) -> (i32, i32, i32) {
    %c0_i32 = arith.constant 0 : i32
    %c0_i32_0 = arith.constant 0 : i32
    %c0_i32_1 = arith.constant 0 : i32
    return %arg0, %c0_i32, %c0_i32_0 : i32, i32, i32
  }
  func.func @transform_1(%arg0: i32) -> (i32, i32) {
    %c0_i32 = arith.constant 0 : i32
    %c0_i32_0 = arith.constant 0 : i32
    return %arg0, %c0_i32 : i32, i32
  }
  func.func @transform_2(%arg0: i32) -> (i32, i32) {
    %c0_i32 = arith.constant 0 : i32
    %c0_i32_0 = arith.constant 0 : i32
    %c0_i32_1 = arith.constant 0 : i32
    return %c0_i32, %c0_i32_0 : i32, i32
  }
  func.func @transform_3(%arg0: i32) -> (i32, i32) {
    %c0_i32 = arith.constant 0 : i32
    %c0_i32_0 = arith.constant 0 : i32
    %c0_i32_1 = arith.constant 0 : i32
    return %c0_i32, %c0_i32_0 : i32, i32
  }
  func.func @transform_4(%arg0: i32) -> (i32, i32) {
    %c0_i32 = arith.constant 0 : i32
    %c0_i32_0 = arith.constant 0 : i32
    %c0_i32_1 = arith.constant 0 : i32
    return %c0_i32, %c0_i32_0 : i32, i32
  }
  func.func @transform_5(%arg0: i32) -> (i32, i32) {
    %c0_i32 = arith.constant 0 : i32
    %c0_i32_0 = arith.constant 0 : i32
    return %arg0, %c0_i32 : i32, i32
  }
}

</mosaic_0001>

<bundles_post_ra>
// kernel: tpu_custom_call.1
= control target key start
LH: loop header
LB: loop body
LE: loop exit
PB: predicated region body
PF: predicated region fallthrough
CT: control target
= control target key end

     0   :  { %10 = vsyncpa [#allocation3], 0  ;;  %s538_s0 = inlined_call_operand.hbm [shape: f32[2,8,32], index: 0, kind: input, shape index: {}]   ;;  %s539_s1 = inlined_call_operand.vmem [shape: f32[2,8], index: 1, kind: input, shape index: {}]   ;;  %s540_s2 = inlined_call_operand.hbm [shape: f32[32,32], index: 2, kind: input, shape index: {}]   ;;  %s541_s3 = inlined_call_operand.vmem [shape: f32[1,32], index: 3, kind: input, shape index: {}]   ;;  %s542_s4 = inlined_call_operand.vmem [shape: f32[1,32], index: 4, kind: input, shape index: {}]   ;;  %s543_s5 = inlined_call_operand.hbm [shape: f32[2,32], index: 5, kind: output, shape index: {}]  }
   0x1   :  { %11 = vsyncpa [#allocation6], 0 }
   0x2   :  { %12 = vsyncpa [#allocation4], 0  ;;  %s428_s18 = smov [#allocation2]   ;;  %s356_s22 = scalar_lea.hbm %s538_s0, 256 }
   0x3   :  { %s18_s19 = sshll.u32 %s428_s18, 4  ;;  %p357_p0 = scmp.ne.s32.totalorder %s538_s0, %s356_s22  ;;  %s19_s19 = int_to_ptr.vmem [resolvable:$true] %s18_s19 }
   0x4   :  { %p360_p1 = scmp.lt.u32.totalorder %s356_s22, %s538_s0 }
   0x6   :  { %p362_p2 = pnand %p360_p1, %p357_p0 }
   0x8   :  { %365 = shalt.err (!%p362_p2)
}
   0x9   :  { %s366_s27 = scalar_lea.vmem %s19_s19, 256  ;;  %p371_p4 = scmp.lt.s32.totalorder %s19_s19, %s19_s19 }
   0xa   :  { %p367_p3 = scmp.ne.s32.totalorder %s19_s19, %s366_s27  ;;  %p372_p5 = scmp.lt.s32.totalorder %s366_s27, %s366_s27 }
   0xc   :  { %p373_p6 = por %p372_p5, %p371_p4 }
   0xe   :  { %p374_p7 = pnand %p373_p6, %p367_p3 }
  0x10   :  { %377 = shalt.err (!%p374_p7)
}
  0x11   :  { %s429_s28 = smov 128   ;;  %s430_s29 = smov 8  }
  0x12   :  { %24 = dma.hbm_to_vmem [thread:$0]  %s538_s0, 256, %s19_s19, [#allocation3], %s429_s28, %s429_s28, %s430_s29  }
  0x13   :  { %s431_s7 = smov [#allocation5]   ;;  %s378_s11 = scalar_lea.hbm %s540_s2, 512 }
  0x14   :  { %s32_s8 = sshll.u32 %s431_s7, 4  ;;  %p379_p8 = scmp.ne.s32.totalorder %s540_s2, %s378_s11  ;;  %s33_s8 = int_to_ptr.vmem [resolvable:$true] %s32_s8 }
  0x15   :  { %p382_p9 = scmp.lt.u32.totalorder %s378_s11, %s540_s2 }
  0x17   :  { %p384_p10 = pnand %p382_p9, %p379_p8 }
  0x19   :  { %387 = shalt.err (!%p384_p10)
}
  0x1a   :  { %s388_s16 = scalar_lea.vmem %s33_s8, 512  ;;  %p393_p12 = scmp.lt.s32.totalorder %s33_s8, %s33_s8 }
  0x1b   :  { %p389_p11 = scmp.ne.s32.totalorder %s33_s8, %s388_s16  ;;  %p394_p13 = scmp.lt.s32.totalorder %s388_s16, %s388_s16 }
  0x1d   :  { %p395_p0 = por %p394_p13, %p393_p12 }
  0x1f   :  { %p396_p1 = pnand %p395_p0, %p389_p11 }
  0x21   :  { %399 = shalt.err (!%p396_p1)
}
  0x22   :  { %38 = dma.hbm_to_vmem [thread:$0]  %s540_s2, 512, %s33_s8, [#allocation6], %s429_s28, %s429_s28, %s430_s29  }
  0x23   :  { %422 = dma.done.wait [#allocation3], 256  }
  0x24   :  { %423 = vsyncadd [#allocation3], 4294967040 }
  0x25   :  { %424 = dma.done.wait [#allocation6], 512  }
  0x26   :  { %425 = vsyncadd [#allocation6], 4294966784  ;;  %vm63_vm0 = vcmask 261120   ;;  %v52_v0 = vld [vmem:[#allocation5] sm:$0xff]  ;;  %v53_v1 = vld [vmem:[#allocation5 + $0x8] sm:$0xff]  ;;  %v163_v8 = vlaneseq  ;;  %v432_v27 = vmov 0  }
  0x27   :  { %v54_v2 = vld [vmem:[#allocation5 + $0x10] sm:$0xff]  ;;  %v328_v3 = vpack.c.bf16 %v53_v1, %v52_v0  ;;  %v55_v4 = vld [vmem:[#allocation5 + $0x18] sm:$0xff]  ;;  %342 = vset.pattern.permute.xlu0 %v432_v27  ;;  %343 = vset.pattern.permute.xlu1 %v432_v27  ;;  %vm199_vm1 = vcmask 1041409   ;;  %vm202_vm2 = vcmask 58368   ;;  %vm289_vm3 = vcmask 254976  }
  0x28   :  { %v488_v5 = vld [vmem:[#allocation2] sm:$0xff]  ;;  %v332_v6 = vpack.c.bf16 %v55_v4, %v54_v2  ;;  %v492_v7 = vld [vmem:[#allocation2 + $0x8] sm:$0xff]  ;;  %v164_v9 = vshrl.u32 %v163_v8, 7  ;;  %v190_v34 = vand.u32 127, %v163_v8 }
  0x29   :  { %325 = vmatprep.mubr.msk.f32.mxu0 %vm63_vm0, %v488_v5  ;;  %329 = vmatprep.subr.bf16.mxu0 %v328_v3  ;;  %v49_v10 = vld [vmem:[%s539_s1] sm:$0x3] }
  0x2a   :  { %331 = vmatpush3.bf16.msra.mxu0 %v328_v3  ;;  %v499_v11 = vsub.s32 0, %v164_v9  ;;  %v501_v12 = vsub.s32 1, %v164_v9  ;;  %v307_v15 = vld [vmem:[%s541_s3] ss:$0 sm:$0xff]  ;;  %v193_v35 = vsub.s32 %v190_v34, %v164_v9  ;;  %s433_s3 = smov [#allocation7]  }
  0x2b   :  { %333 = vmatprep.subr.bf16.mxu0 %v332_v6  ;;  %v310_v20 = vld [vmem:[%s542_s4] ss:$0 sm:$0xff]  ;;  %s297_s4 = sshll.u32 %s433_s3, 4  ;;  %s298_s4 = int_to_ptr.vmem [resolvable:$true] %s297_s4 }
  0x2c   :  { %v166_v13 = vrot.slane %v49_v10, %v499_v11  ;;  %v173_v14 = vrot.slane %v49_v10, %v501_v12  ;;  %s400_s22 = scalar_lea.vmem %s298_s4, 32  ;;  %p405_p3 = scmp.lt.s32.totalorder %s298_s4, %s298_s4 }
  0x2d   :  { %p401_p2 = scmp.ne.s32.totalorder %s298_s4, %s400_s22  ;;  %p406_p4 = scmp.lt.s32.totalorder %s400_s22, %s400_s22 }
  0x2e   :  { %335 = vmatpush3.bf16.msra.mxu0 %v332_v6  ;;  %168 = vbcast.lane.b32.xlu1 %v166_v13, 256 }
  0x2f   :  { %p407_p5 = por %p406_p4, %p405_p3 }
  0x31   :  { %326 = vmatmul.mubr.msk.f32.vlgmr.msra.gmra.mrb[0].mxu0 %vm63_vm0, %v492_v7  ;;  %p408_p6 = pnand %p407_p5, %p401_p2 }
  0x32   :  { %175 = vbcast.lane.b32.xlu1 %v173_v14, 256 }
  0xa0   :  { %v169_v28 = vpop.permute.xlu1 %168 }
  0xa4   :  { %v176_v31 = vpop.permute.xlu1 %175 }
 0x104   :  { %v327_v16 = vpop.f32.mrb[0].mxu0 }
 0x105   :  { %v142_v17 = vadd.f32 %v327_v16, %v307_v15  ;;  %v136_v18 = vpop.f32.mrb[1].mxu0 }
 0x106   :  { %v137_v19 = vadd.f32 %v307_v15, %v136_v18 }
 0x107   :  { %344 = vtanh.f32 %v142_v17 }
 0x108   :  { %346 = vtanh.f32 %v137_v19 }
 0x111   :  { %v345_v21 = vpop.eup %344 }
 0x112   :  { %v347_v22 = vpop.eup %346  ;;  %v155_v25 = vmul.f32 %v345_v21, %v310_v20 }
 0x113   :  { %v154_v23 = vmul.f32 %v347_v22, %v310_v20 }
 0x114   :  { %v159_v26 = vsel %vm63_vm0, %v155_v25, 0.0 }
 0x115   :  { %v156_v24 = vsel %vm63_vm0, %v154_v23, 0.0 }
 0x116   :  { %157 = vadd.xlane.f32.xlu0 %v156_v24 }
 0x11a   :  { %160 = vadd.xlane.f32.xlu0 %v159_v26 }
 0x1a3   :  { %v158_v29 = vpop.xlane.xlu0 %157 }
 0x1a4   :  { %v179_v30 = vadd.f32 %v169_v28, %v158_v29 }
 0x1a6   :  { %184 = vperm.xlu0 %342, %v179_v30  }
 0x1a7   :  { %v161_v32 = vpop.xlane.xlu0 %160 }
 0x1a8   :  { %v180_v33 = vadd.f32 %v176_v31, %v161_v32 }
 0x1aa   :  { %187 = vperm.xlu1 %343, %v180_v33  }
 0x225   :  { %v185_v36 = vpop.permute.xlu0 %184 }
 0x226   :  { %v194_v38 = vrot.slane %v185_v36, %v193_v35 }
 0x229   :  { %v188_v37 = vpop.permute.xlu1 %187 }
 0x22a   :  { %v198_v39 = vrot.slane %v188_v37, %v193_v35 }
 0x22c   :  { %v200_v40 = vsel %vm199_vm1, %v198_v39, %v194_v38 }
 0x22d   :  { %v203_v41 = vsel %vm202_vm2, %v200_v40, -inf }
 0x22e   :  { %204 = vmax.xlane.f32.xlu1 %v203_v41 }
 0x2bb   :  { %v205_v42 = vpop.xlane.xlu1 %204 }
 0x2bc   :  { %v210_v43 = vrot.slane %v205_v42, %v499_v11  ;;  %v214_v44 = vrot.slane %v205_v42, %v501_v12 }
 0x2be   :  { %v217_v45 = vsub.f32 %v179_v30, %v210_v43  ;;  %v218_v46 = vsub.f32 %v180_v33, %v214_v44 }
 0x2c0   :  { %v219_v47 = vmul.f32 1.442695, %v217_v45  ;;  %v221_v48 = vmul.f32 1.442695, %v218_v46 }
 0x2c2   :  { %348 = vpow2.f32 %v219_v47 }
 0x2c3   :  { %350 = vpow2.f32 %v221_v48 }
 0x2cc   :  { %v349_v49 = vpop.eup %348 }
 0x2cd   :  { %v351_v50 = vpop.eup %350  ;;  %226 = vperm.xlu1 %343, %v349_v49  }
 0x2ce   :  { %229 = vperm.xlu0 %342, %v351_v50  }
 0x34c   :  { %v227_v51 = vpop.permute.xlu1 %226 }
 0x34d   :  { %v230_v52 = vpop.permute.xlu0 %229  ;;  %v234_v53 = vrot.slane %v227_v51, %v193_v35 }
 0x34e   :  { %v238_v54 = vrot.slane %v230_v52, %v193_v35 }
 0x350   :  { %v239_v55 = vsel %vm199_vm1, %v238_v54, %v234_v53 }
 0x351   :  { %v241_v56 = vsel %vm202_vm2, %v239_v55, 0.0 }
 0x352   :  { %242 = vadd.xlane.f32.xlu0 %v241_v56 }
 0x3df   :  { %v243_v57 = vpop.xlane.xlu0 %242 }
 0x3e0   :  { %v248_v58 = vrot.slane %v243_v57, %v499_v11  ;;  %v252_v59 = vrot.slane %v243_v57, %v501_v12 }
 0x3e2   :  { %352 = vrcp.f32 %v248_v58 }
 0x3e3   :  { %354 = vrcp.f32 %v252_v59 }
 0x3ec   :  { %v353_v60 = vpop.eup %352 }
 0x3ed   :  { %v256_v61 = vmul.f32 %v353_v60, %v349_v49  ;;  %v355_v62 = vpop.eup %354 }
 0x3ee   :  { %v258_v63 = vmul.f32 %v355_v62, %v351_v50 }
 0x3ef   :  { %261 = vperm.xlu1 %343, %v256_v61  }
 0x3f3   :  { %266 = vperm.xlu1 %343, %v258_v63  }
 0x46e   :  { %v262_v0 = vpop.permute.xlu1 %261 }
 0x46f   :  { %v269_v1 = vmul.f32 %v262_v0, %v488_v5 }
 0x471   :  { %v271_v2 = vsel %vm63_vm0, %v269_v1, 0.0 }
 0x472   :  { %v272_v3 = vrot.slane %v271_v2, 4  ;;  %v267_v4 = vpop.permute.xlu1 %266 }
 0x473   :  { %v270_v6 = vmul.f32 %v267_v4, %v492_v7 }
 0x474   :  { %v273_v8 = vadd.f32 %v272_v3, %v271_v2 }
 0x475   :  { %v278_v9 = vsel %vm63_vm0, %v270_v6, 0.0 }
 0x476   :  { %v274_v10 = vrot.slane %v273_v8, 2  ;;  %v279_v11 = vrot.slane %v278_v9, 4 }
 0x478   :  { %v275_v12 = vadd.f32 %v274_v10, %v273_v8  ;;  %v280_v13 = vadd.f32 %v279_v11, %v278_v9 }
 0x47a   :  { %v281_v14 = vrot.slane %v280_v13, 2  ;;  %v276_v15 = vrot.slane %v275_v12, 1 }
 0x47c   :  { %v282_v16 = vadd.f32 %v281_v14, %v280_v13  ;;  %v277_v5 = vadd.f32 %v276_v15, %v275_v12 }
 0x47e   :  { %v283_v17 = vrot.slane %v282_v16, 1 }
 0x480   :  { %v284_v18 = vadd.f32 %v283_v17, %v282_v16 }
 0x482   :  { %v287_v19 = vsel %vm199_vm1, %v284_v18, %v277_v5 }
 0x483   :  { %290 = vst.msk [vmem:[#allocation7] sm:$0x3] %vm289_vm3, %v287_v19 }
 0x484   :  { %411 = shalt.err (!%p408_p6)
}
 0x485   :  { %s412_s25 = scalar_lea.hbm %s543_s5, 32 }
 0x486   :  { %p413_p7 = scmp.ne.s32.totalorder %s543_s5, %s412_s25  ;;  %p416_p8 = scmp.lt.u32.totalorder %s412_s25, %s543_s5 }
 0x488   :  { %p418_p9 = pnand %p416_p8, %p413_p7 }
 0x48a   :  { %421 = shalt.err (!%p418_p9)
}
 0x48b   :  { %300 = dma.vmem_to_hbm [thread:$0]  %s298_s4, 32, %s543_s5, [#allocation4]  }
 0x48c   :  { %426 = dma.done.wait [#allocation4], 32  }
 0x48d   :  { %427 = vsyncadd [#allocation4], 4294967264 }
 0x48e   :  { %304 = vsyncpa [#allocation3], 1 }
 0x48f   :  { %305 = vsyncpa [#allocation6], 1 }
 0x490   :  { %306 = vsyncpa [#allocation4], 1 }

</bundles_post_ra>
